<compile_context>
chip_gen: v5e
topology: v5e:2x2
jax: 0.10.0
libtpu: 0.0.40
codegen_flags: <defaults>
</compile_context>

<pallas_src>
import functools

import jax
import jax.numpy as jnp
from jax.experimental import pallas as pl
from jax.experimental.pallas import tpu as pltpu

P = 3                    # samples packed per 128-lane row
LANES = 128              # hidden lane width (3*40 = 120 used, 8 zero pad)
HIDDEN = 40
IN_DIM = 3
IN_SLOT = 8              # per-sample input slot width (3 features + 5 zeros)
IN_PACK = P * IN_SLOT    # 24
OUT_DIM = 5
OUT_SLOT = 8             # per-sample output slot width (5 outputs + 3 zeros)
OUT_PACK = P * OUT_SLOT  # 24
N_LAYERS = 8


def _fc_kernel(x_ref, w_in_ref, w_h_ref, w_out_ref, b_hid_ref, b_out_ref,
               o_ref, *, compute_dtype):
    cd = compute_dtype

    # linear_in (no activation, matching PyTorch forward): (TM,24)x(24,128).
    h = (jnp.dot(x_ref[...].astype(cd), w_in_ref[...].astype(cd),
                 preferred_element_type=jnp.float32)
         + b_hid_ref[0:1, :])

    # 8 hidden layers, statically unrolled: h = tanh(W h + b).
    # Matmul operands in `cd` (bf16 fast path), accumulation / bias / tanh in
    # f32 (keeps VPU/EUP work f32 — required on v5e, harmless elsewhere).
    for l in range(N_LAYERS):
        z = (jnp.dot(h.astype(cd), w_h_ref[l].astype(cd),
                     preferred_element_type=jnp.float32)
             + b_hid_ref[l + 1:l + 2, :])
        h = jnp.tanh(z)

    # linear_out (no activation): (TM,128)x(128,24) -> narrow 24-lane store.
    o_ref[...] = (jnp.dot(h.astype(cd), w_out_ref[...].astype(cd),
                          preferred_element_type=jnp.float32)
                  + b_out_ref[...]).astype(o_ref.dtype)


def init_params(key, neurons=HIDDEN, layer=N_LAYERS):
    """PyTorch nn.Linear-style init: U(-1/sqrt(fan_in), 1/sqrt(fan_in))."""
    params = {}
    keys = jax.random.split(key, 2 * (layer + 2))
    ki = iter(keys)

    def linear(kw, kb, fan_in, fan_out):
        bound = 1.0 / jnp.sqrt(fan_in)
        w = jax.random.uniform(kw, (fan_in, fan_out), jnp.float32, -bound, bound)
        b = jax.random.uniform(kb, (fan_out,), jnp.float32, -bound, bound)
        return w, b

    params["w_in"], params["b_in"] = linear(next(ki), next(ki), IN_DIM, neurons)
    params["w_h"], params["b_h"] = [], []
    for _ in range(layer):
        w, b = linear(next(ki), next(ki), neurons, neurons)
        params["w_h"].append(w)
        params["b_h"].append(b)
    params["w_out"], params["b_out"] = linear(next(ki), next(ki), neurons, OUT_DIM)
    return params


def pack_params(params, dtype=jnp.bfloat16):
    """One-time packing: block-diagonal (3 samples/row) weights, zero-padded
    to MXU-friendly shapes, stored in `dtype` (bf16 by default).  Biases stay
    f32 (added post-matmul)."""
    w_in = jnp.zeros((IN_PACK, LANES), jnp.float32)
    w_h = jnp.zeros((N_LAYERS, LANES, LANES), jnp.float32)
    w_out = jnp.zeros((LANES, OUT_PACK), jnp.float32)
    b_hid = jnp.zeros((N_LAYERS + 1, LANES), jnp.float32)
    b_out = jnp.zeros((1, OUT_PACK), jnp.float32)

    for s in range(P):
        w_in = w_in.at[s * IN_SLOT:s * IN_SLOT + IN_DIM,
                       s * HIDDEN:(s + 1) * HIDDEN].set(params["w_in"])
        for l, w in enumerate(params["w_h"]):
            w_h = w_h.at[l, s * HIDDEN:(s + 1) * HIDDEN,
                         s * HIDDEN:(s + 1) * HIDDEN].set(w)
        w_out = w_out.at[s * HIDDEN:(s + 1) * HIDDEN,
                         s * OUT_SLOT:s * OUT_SLOT + OUT_DIM].set(params["w_out"])
        b_hid = b_hid.at[0, s * HIDDEN:(s + 1) * HIDDEN].set(params["b_in"])
        for l, b in enumerate(params["b_h"]):
            b_hid = b_hid.at[l + 1, s * HIDDEN:(s + 1) * HIDDEN].set(b)
        b_out = b_out.at[0, s * OUT_SLOT:s * OUT_SLOT + OUT_DIM].set(params["b_out"])

    return {"w_in": w_in.astype(dtype), "w_h": w_h.astype(dtype),
            "w_out": w_out.astype(dtype), "b_hid": b_hid, "b_out": b_out}


def _choose_tm(n_rows):
    """Single tile for small batches (per-step ~0.35us overhead + per-step MXU
    weight reloads dominate, and splitting buys nothing on 1-TC chips); large
    tiles for big batches to amortize grid overhead."""
    if n_rows <= 512:
        return max(8, -(-n_rows // 8) * 8)
    if n_rows <= 4096:
        return 512
    return 1024


@functools.partial(jax.jit, static_argnames=("compute_dtype",))
def fc_model_pallas(x, packed, compute_dtype=jnp.bfloat16):
    """x: (N, 3) float32, packed = pack_params(params) -> (N, 5) float32."""
    n = x.shape[0]
    x = x.astype(jnp.float32)

    n_rows = -(-n // P)                       # packed rows needed (3 samples/row)
    tm = _choose_tm(n_rows)
    steps = -(-n_rows // tm)
    if steps > 1 and steps % 2 == 1:
        steps += 1                            # even step count -> balanced v7x megacore
    n_pad_rows = steps * tm

    # Pack 3 samples per 128-lane row: sample 3r+s -> row r, columns [8s,8s+3).
    # (Small staging copy; the lane packing can't be expressed by a BlockSpec.)
    x_p = jnp.zeros((n_pad_rows * P, IN_SLOT), jnp.float32).at[:n, :IN_DIM].set(x)
    x_p = x_p.reshape(n_pad_rows, IN_PACK)

    c2 = lambda i: (0, 0)
    c3 = lambda i: (0, 0, 0)

    out = pl.pallas_call(
        functools.partial(_fc_kernel, compute_dtype=compute_dtype),
        out_shape=jax.ShapeDtypeStruct((n_pad_rows, OUT_PACK), jnp.float32),
        grid_spec=pltpu.PrefetchScalarGridSpec(
            num_scalar_prefetch=0,
            grid=(steps,),
            in_specs=[
                pl.BlockSpec((tm, IN_PACK), lambda i: (i, 0)),          # x tiles
                pl.BlockSpec((IN_PACK, LANES), c2),                     # w_in (resident)
                pl.BlockSpec((N_LAYERS, LANES, LANES), c3),             # w_h stack (resident)
                pl.BlockSpec((LANES, OUT_PACK), c2),                    # w_out (resident)
                pl.BlockSpec((N_LAYERS + 1, LANES), c2),                # hidden biases
                pl.BlockSpec((1, OUT_PACK), c2),                        # output bias
            ],
            out_specs=pl.BlockSpec((tm, OUT_PACK), lambda i: (i, 0)),
        ),
        compiler_params=pltpu.CompilerParams(
            dimension_semantics=("parallel",)),
    )(x_p, packed["w_in"], packed["w_h"], packed["w_out"],
      packed["b_hid"], packed["b_out"])

    # Unpack: row r, slot s, cols [8s,8s+5) -> sample 3r+s outputs.
    out = out.reshape(n_pad_rows * P, OUT_SLOT)
    return out[:n, :OUT_DIM]


def fc_model_ref(x, params):
    h = x @ params["w_in"] + params["b_in"]
    for w, b in zip(params["w_h"], params["b_h"]):
        h = jnp.tanh(h @ w + b)
    return h @ params["w_out"] + params["b_out"]


if __name__ == "__main__":
    key = jax.random.PRNGKey(0)
    kx, kp = jax.random.split(key)

    n = 200  # batch of collocation points: (N, 3) inputs -> (N, 5) outputs
    x = jax.random.normal(kx, (n, IN_DIM), jnp.float32)
    params = init_params(kp)

    # one-time weight packing (hoisted out of the per-call path)
    packed_bf16 = pack_params(params, dtype=jnp.bfloat16)   # default fast path
    packed_f32 = pack_params(params, dtype=jnp.float32)     # strict-check path
    jax.block_until_ready((packed_bf16, packed_f32))

    y_ref = fc_model_ref(x, params)

    # strict f32 path: padded lanes stay exactly zero (zero-padded weights /
    # biases + tanh(0)=0), so valid lanes match the reference to f32 accuracy.
    y_f32 = fc_model_pallas(x, packed_f32, compute_dtype=jnp.float32)
    jax.block_until_ready(y_f32)
    assert y_f32.shape == (n, OUT_DIM)
    assert jnp.allclose(y_f32, y_ref, atol=1e-5, rtol=1e-5), "f32 mismatch vs reference"

    # default bf16 fast path (bf16 MXU operands, f32 accumulation): looser
    # tolerance is expected behavior of the reduced-precision path, not a bug.
    y = fc_model_pallas(x, packed_bf16)
    jax.block_until_ready(y)
    assert y.shape == (n, OUT_DIM)
    assert jnp.allclose(y, y_ref, atol=5e-2, rtol=5e-2), "bf16 mismatch vs reference"

    print("KERNEL_OK")
</pallas_src>

<mosaic_0001>
module attributes {stable_mosaic.version = 11 : i64} {
  func.func @_fc_kernel(%arg0: i32, %arg1: memref<72x24xf32, #tpu.memory_space<vmem>>, %arg2: memref<24x128xf32, #tpu.memory_space<vmem>>, %arg3: memref<8x128x128xf32, #tpu.memory_space<vmem>>, %arg4: memref<128x24xf32, #tpu.memory_space<vmem>>, %arg5: memref<9x128xf32, #tpu.memory_space<vmem>>, %arg6: memref<1x24xf32, #tpu.memory_space<vmem>>, %arg7: memref<72x24xf32, #tpu.memory_space<vmem>>) attributes {dimension_semantics = [#tpu.dimension_semantics<parallel>], iteration_bounds = array<i64: 1>, scalar_prefetch = 0 : i64, scratch_operands = 0 : i64, tpu.core_type = #tpu.core_type<tc>, window_params = [{transform_indices = @transform_0, window_bounds = array<i64: 72, 24>}, {pipeline_mode = #tpu.pipeline_mode<synchronous>, transform_indices = @transform_1, window_bounds = array<i64: 24, 128>}, {pipeline_mode = #tpu.pipeline_mode<synchronous>, transform_indices = @transform_2, window_bounds = array<i64: 8, 128, 128>}, {pipeline_mode = #tpu.pipeline_mode<synchronous>, transform_indices = @transform_3, window_bounds = array<i64: 128, 24>}, {pipeline_mode = #tpu.pipeline_mode<synchronous>, transform_indices = @transform_4, window_bounds = array<i64: 9, 128>}, {pipeline_mode = #tpu.pipeline_mode<synchronous>, transform_indices = @transform_5, window_bounds = array<i64: 1, 24>}, {transform_indices = @transform_6, window_bounds = array<i64: 72, 24>}]} {
    %c0 = arith.constant 0 : index
    %c0_0 = arith.constant 0 : index
    %0 = vector.load %arg1[%c0, %c0_0] : memref<72x24xf32, #tpu.memory_space<vmem>>, vector<72x24xf32>
    %c0_1 = arith.constant 0 : index
    %c0_2 = arith.constant 0 : index
    %1 = vector.load %arg2[%c0_1, %c0_2] : memref<24x128xf32, #tpu.memory_space<vmem>>, vector<24x128xf32>
    %cst = arith.constant dense<0.000000e+00> : vector<72x128xf32>
    %2 = tpu.matmul %0, %1, %cst {dimension_numbers = #tpu.dot_dimension_numbers<[1], [0], [0], [1], [0, 0, 1, 1], [], []>} : vector<72x24xf32>, vector<24x128xf32>, vector<72x128xf32> -> vector<72x128xf32>
    %c0_3 = arith.constant 0 : index
    %c0_4 = arith.constant 0 : index
    %3 = vector.load %arg5[%c0_3, %c0_4] : memref<9x128xf32, #tpu.memory_space<vmem>>, vector<1x128xf32>
    %4 = vector.broadcast %3 : vector<1x128xf32> to vector<72x128xf32>
    %5 = arith.addf %2, %4 : vector<72x128xf32>
    %c0_5 = arith.constant 0 : index
    %c0_6 = arith.constant 0 : index
    %c0_7 = arith.constant 0 : index
    %6 = vector.load %arg3[%c0_5, %c0_6, %c0_7] : memref<8x128x128xf32, #tpu.memory_space<vmem>>, vector<1x128x128xf32>
    %7 = vector.shape_cast %6 : vector<1x128x128xf32> to vector<128x128xf32>
    %cst_8 = arith.constant dense<0.000000e+00> : vector<72x128xf32>
    %8 = tpu.matmul %5, %7, %cst_8 {dimension_numbers = #tpu.dot_dimension_numbers<[1], [0], [0], [1], [0, 0, 1, 1], [], []>} : vector<72x128xf32>, vector<128x128xf32>, vector<72x128xf32> -> vector<72x128xf32>
    %c1 = arith.constant 1 : index
    %c0_9 = arith.constant 0 : index
    %9 = vector.load %arg5[%c1, %c0_9] : memref<9x128xf32, #tpu.memory_space<vmem>>, vector<1x128xf32>
    %10 = vector.broadcast %9 : vector<1x128xf32> to vector<72x128xf32>
    %11 = arith.addf %8, %10 : vector<72x128xf32>
    %12 = math.tanh %11 : vector<72x128xf32>
    %c1_10 = arith.constant 1 : index
    %c0_11 = arith.constant 0 : index
    %c0_12 = arith.constant 0 : index
    %13 = vector.load %arg3[%c1_10, %c0_11, %c0_12] : memref<8x128x128xf32, #tpu.memory_space<vmem>>, vector<1x128x128xf32>
    %14 = vector.shape_cast %13 : vector<1x128x128xf32> to vector<128x128xf32>
    %cst_13 = arith.constant dense<0.000000e+00> : vector<72x128xf32>
    %15 = tpu.matmul %12, %14, %cst_13 {dimension_numbers = #tpu.dot_dimension_numbers<[1], [0], [0], [1], [0, 0, 1, 1], [], []>} : vector<72x128xf32>, vector<128x128xf32>, vector<72x128xf32> -> vector<72x128xf32>
    %c2 = arith.constant 2 : index
    %c0_14 = arith.constant 0 : index
    %16 = vector.load %arg5[%c2, %c0_14] : memref<9x128xf32, #tpu.memory_space<vmem>>, vector<1x128xf32>
    %17 = vector.broadcast %16 : vector<1x128xf32> to vector<72x128xf32>
    %18 = arith.addf %15, %17 : vector<72x128xf32>
    %19 = math.tanh %18 : vector<72x128xf32>
    %c2_15 = arith.constant 2 : index
    %c0_16 = arith.constant 0 : index
    %c0_17 = arith.constant 0 : index
    %20 = vector.load %arg3[%c2_15, %c0_16, %c0_17] : memref<8x128x128xf32, #tpu.memory_space<vmem>>, vector<1x128x128xf32>
    %21 = vector.shape_cast %20 : vector<1x128x128xf32> to vector<128x128xf32>
    %cst_18 = arith.constant dense<0.000000e+00> : vector<72x128xf32>
    %22 = tpu.matmul %19, %21, %cst_18 {dimension_numbers = #tpu.dot_dimension_numbers<[1], [0], [0], [1], [0, 0, 1, 1], [], []>} : vector<72x128xf32>, vector<128x128xf32>, vector<72x128xf32> -> vector<72x128xf32>
    %c3 = arith.constant 3 : index
    %c0_19 = arith.constant 0 : index
    %23 = vector.load %arg5[%c3, %c0_19] : memref<9x128xf32, #tpu.memory_space<vmem>>, vector<1x128xf32>
    %24 = vector.broadcast %23 : vector<1x128xf32> to vector<72x128xf32>
    %25 = arith.addf %22, %24 : vector<72x128xf32>
    %26 = math.tanh %25 : vector<72x128xf32>
    %c3_20 = arith.constant 3 : index
    %c0_21 = arith.constant 0 : index
    %c0_22 = arith.constant 0 : index
    %27 = vector.load %arg3[%c3_20, %c0_21, %c0_22] : memref<8x128x128xf32, #tpu.memory_space<vmem>>, vector<1x128x128xf32>
    %28 = vector.shape_cast %27 : vector<1x128x128xf32> to vector<128x128xf32>
    %cst_23 = arith.constant dense<0.000000e+00> : vector<72x128xf32>
    %29 = tpu.matmul %26, %28, %cst_23 {dimension_numbers = #tpu.dot_dimension_numbers<[1], [0], [0], [1], [0, 0, 1, 1], [], []>} : vector<72x128xf32>, vector<128x128xf32>, vector<72x128xf32> -> vector<72x128xf32>
    %c4 = arith.constant 4 : index
    %c0_24 = arith.constant 0 : index
    %30 = vector.load %arg5[%c4, %c0_24] : memref<9x128xf32, #tpu.memory_space<vmem>>, vector<1x128xf32>
    %31 = vector.broadcast %30 : vector<1x128xf32> to vector<72x128xf32>
    %32 = arith.addf %29, %31 : vector<72x128xf32>
    %33 = math.tanh %32 : vector<72x128xf32>
    %c4_25 = arith.constant 4 : index
    %c0_26 = arith.constant 0 : index
    %c0_27 = arith.constant 0 : index
    %34 = vector.load %arg3[%c4_25, %c0_26, %c0_27] : memref<8x128x128xf32, #tpu.memory_space<vmem>>, vector<1x128x128xf32>
    %35 = vector.shape_cast %34 : vector<1x128x128xf32> to vector<128x128xf32>
    %cst_28 = arith.constant dense<0.000000e+00> : vector<72x128xf32>
    %36 = tpu.matmul %33, %35, %cst_28 {dimension_numbers = #tpu.dot_dimension_numbers<[1], [0], [0], [1], [0, 0, 1, 1], [], []>} : vector<72x128xf32>, vector<128x128xf32>, vector<72x128xf32> -> vector<72x128xf32>
    %c5 = arith.constant 5 : index
    %c0_29 = arith.constant 0 : index
    %37 = vector.load %arg5[%c5, %c0_29] : memref<9x128xf32, #tpu.memory_space<vmem>>, vector<1x128xf32>
    %38 = vector.broadcast %37 : vector<1x128xf32> to vector<72x128xf32>
    %39 = arith.addf %36, %38 : vector<72x128xf32>
    %40 = math.tanh %39 : vector<72x128xf32>
    %c5_30 = arith.constant 5 : index
    %c0_31 = arith.constant 0 : index
    %c0_32 = arith.constant 0 : index
    %41 = vector.load %arg3[%c5_30, %c0_31, %c0_32] : memref<8x128x128xf32, #tpu.memory_space<vmem>>, vector<1x128x128xf32>
    %42 = vector.shape_cast %41 : vector<1x128x128xf32> to vector<128x128xf32>
    %cst_33 = arith.constant dense<0.000000e+00> : vector<72x128xf32>
    %43 = tpu.matmul %40, %42, %cst_33 {dimension_numbers = #tpu.dot_dimension_numbers<[1], [0], [0], [1], [0, 0, 1, 1], [], []>} : vector<72x128xf32>, vector<128x128xf32>, vector<72x128xf32> -> vector<72x128xf32>
    %c6 = arith.constant 6 : index
    %c0_34 = arith.constant 0 : index
    %44 = vector.load %arg5[%c6, %c0_34] : memref<9x128xf32, #tpu.memory_space<vmem>>, vector<1x128xf32>
    %45 = vector.broadcast %44 : vector<1x128xf32> to vector<72x128xf32>
    %46 = arith.addf %43, %45 : vector<72x128xf32>
    %47 = math.tanh %46 : vector<72x128xf32>
    %c6_35 = arith.constant 6 : index
    %c0_36 = arith.constant 0 : index
    %c0_37 = arith.constant 0 : index
    %48 = vector.load %arg3[%c6_35, %c0_36, %c0_37] : memref<8x128x128xf32, #tpu.memory_space<vmem>>, vector<1x128x128xf32>
    %49 = vector.shape_cast %48 : vector<1x128x128xf32> to vector<128x128xf32>
    %cst_38 = arith.constant dense<0.000000e+00> : vector<72x128xf32>
    %50 = tpu.matmul %47, %49, %cst_38 {dimension_numbers = #tpu.dot_dimension_numbers<[1], [0], [0], [1], [0, 0, 1, 1], [], []>} : vector<72x128xf32>, vector<128x128xf32>, vector<72x128xf32> -> vector<72x128xf32>
    %c7 = arith.constant 7 : index
    %c0_39 = arith.constant 0 : index
    %51 = vector.load %arg5[%c7, %c0_39] : memref<9x128xf32, #tpu.memory_space<vmem>>, vector<1x128xf32>
    %52 = vector.broadcast %51 : vector<1x128xf32> to vector<72x128xf32>
    %53 = arith.addf %50, %52 : vector<72x128xf32>
    %54 = math.tanh %53 : vector<72x128xf32>
    %c7_40 = arith.constant 7 : index
    %c0_41 = arith.constant 0 : index
    %c0_42 = arith.constant 0 : index
    %55 = vector.load %arg3[%c7_40, %c0_41, %c0_42] : memref<8x128x128xf32, #tpu.memory_space<vmem>>, vector<1x128x128xf32>
    %56 = vector.shape_cast %55 : vector<1x128x128xf32> to vector<128x128xf32>
    %cst_43 = arith.constant dense<0.000000e+00> : vector<72x128xf32>
    %57 = tpu.matmul %54, %56, %cst_43 {dimension_numbers = #tpu.dot_dimension_numbers<[1], [0], [0], [1], [0, 0, 1, 1], [], []>} : vector<72x128xf32>, vector<128x128xf32>, vector<72x128xf32> -> vector<72x128xf32>
    %c8 = arith.constant 8 : index
    %c0_44 = arith.constant 0 : index
    %58 = vector.load %arg5[%c8, %c0_44] : memref<9x128xf32, #tpu.memory_space<vmem>>, vector<1x128xf32>
    %59 = vector.broadcast %58 : vector<1x128xf32> to vector<72x128xf32>
    %60 = arith.addf %57, %59 : vector<72x128xf32>
    %61 = math.tanh %60 : vector<72x128xf32>
    %c0_45 = arith.constant 0 : index
    %c0_46 = arith.constant 0 : index
    %62 = vector.load %arg4[%c0_45, %c0_46] : memref<128x24xf32, #tpu.memory_space<vmem>>, vector<128x24xf32>
    %cst_47 = arith.constant dense<0.000000e+00> : vector<72x24xf32>
    %63 = tpu.matmul %61, %62, %cst_47 {dimension_numbers = #tpu.dot_dimension_numbers<[1], [0], [0], [1], [0, 0, 1, 1], [], []>} : vector<72x128xf32>, vector<128x24xf32>, vector<72x24xf32> -> vector<72x24xf32>
    %c0_48 = arith.constant 0 : index
    %c0_49 = arith.constant 0 : index
    %64 = vector.load %arg6[%c0_48, %c0_49] : memref<1x24xf32, #tpu.memory_space<vmem>>, vector<1x24xf32>
    %65 = vector.broadcast %64 : vector<1x24xf32> to vector<72x24xf32>
    %66 = arith.addf %63, %65 : vector<72x24xf32>
    %c0_50 = arith.constant 0 : index
    %c0_51 = arith.constant 0 : index
    %67 = vector.load %arg7[%c0_50, %c0_51] : memref<72x24xf32, #tpu.memory_space<vmem>>, vector<72x24xf32>
    tpu.vector_store %arg7[%c0_50, %c0_51], %66 {strides = array<i32>} : memref<72x24xf32, #tpu.memory_space<vmem>>, vector<72x24xf32>,
    return
  }
  func.func @transform_0(%arg0: i32) -> (i32, i32) {
    %c0_i32 = arith.constant 0 : i32
    %c0_i32_0 = arith.constant 0 : i32
    return %arg0, %c0_i32 : i32, i32
  }
  func.func @transform_1(%arg0: i32) -> (i32, i32) {
    %c0_i32 = arith.constant 0 : i32
    %c0_i32_0 = arith.constant 0 : i32
    %c0_i32_1 = arith.constant 0 : i32
    return %c0_i32, %c0_i32_0 : i32, i32
  }
  func.func @transform_2(%arg0: i32) -> (i32, i32, i32) {
    %c0_i32 = arith.constant 0 : i32
    %c0_i32_0 = arith.constant 0 : i32
    %c0_i32_1 = arith.constant 0 : i32
    %c0_i32_2 = arith.constant 0 : i32
    return %c0_i32, %c0_i32_0, %c0_i32_1 : i32, i32, i32
  }
  func.func @transform_3(%arg0: i32) -> (i32, i32) {
    %c0_i32 = arith.constant 0 : i32
    %c0_i32_0 = arith.constant 0 : i32
    %c0_i32_1 = arith.constant 0 : i32
    return %c0_i32, %c0_i32_0 : i32, i32
  }
  func.func @transform_4(%arg0: i32) -> (i32, i32) {
    %c0_i32 = arith.constant 0 : i32
    %c0_i32_0 = arith.constant 0 : i32
    %c0_i32_1 = arith.constant 0 : i32
    return %c0_i32, %c0_i32_0 : i32, i32
  }
  func.func @transform_5(%arg0: i32) -> (i32, i32) {
    %c0_i32 = arith.constant 0 : i32
    %c0_i32_0 = arith.constant 0 : i32
    %c0_i32_1 = arith.constant 0 : i32
    return %c0_i32, %c0_i32_0 : i32, i32
  }
  func.func @transform_6(%arg0: i32) -> (i32, i32) {
    %c0_i32 = arith.constant 0 : i32
    %c0_i32_0 = arith.constant 0 : i32
    return %arg0, %c0_i32 : i32, i32
  }
}

</mosaic_0001>

<bundles_post_ra>
// kernel: fc_model_pallas.1
= control target key start
LH: loop header
LB: loop body
LE: loop exit
PB: predicated region body
PF: predicated region fallthrough
CT: control target
= control target key end

     0   :  { %11 = vsyncpa [#allocation3], 0  ;;  %s1021_s24 = smov [#allocation2]   ;;  %s1022_s26 = smov 128   ;;  %s1287_s0 = inlined_call_operand.vmem [shape: f32[72,24], index: 0, kind: input, shape index: {}]   ;;  %s1288_s1 = inlined_call_operand.vmem [shape: f32[24,128], index: 1, kind: input, shape index: {}]   ;;  %s1289_s2 = inlined_call_operand.hbm [shape: f32[8,128,128], index: 2, kind: input, shape index: {}]   ;;  %s1290_s3 = inlined_call_operand.vmem [shape: f32[128,24], index: 3, kind: input, shape index: {}]   ;;  %s1291_s4 = inlined_call_operand.vmem [shape: f32[9,128], index: 4, kind: input, shape index: {}]   ;;  %s1292_s5 = inlined_call_operand.vmem [shape: f32[1,24], index: 5, kind: input, shape index: {}]   ;;  %s1293_s6 = inlined_call_operand.vmem [shape: f32[72,24], index: 6, kind: output, shape index: {}]  }
   0x1   :  { %s20_s23 = sshll.u32 %s1289_s2, 4  ;;  %s22_s25 = sshll.u32 %s1021_s24, 4  ;;  %s21_s23 = int_to_ptr.hbm [resolvable:$true] %s20_s23  ;;  %s23_s25 = int_to_ptr.vmem [resolvable:$true] %s22_s25 }
   0x2   :  { %s1023_s27 = smov 8  }
   0x3   :  { %28 = dma.hbm_to_vmem [thread:$0]  %s21_s23, 16384, %s23_s25, [#allocation3], %s1022_s26, %s1022_s26, %s1023_s27  }
   0x4   :  { %1019 = dma.done.wait [#allocation3], 16384  }
   0x5   :  { %1020 = vsyncadd [#allocation3], 4294950912  ;;  %v50_v0 = vld [vmem:[%s1288_s1 + $0x10] sm:$0xff]  ;;  %v49_v1 = vld [vmem:[%s1288_s1 + $0x8] sm:$0xff]  ;;  %vm53_vm0 = vcmask 195584  }
   0x6   :  { %94 = vmatpush.msra.mxu0 %v50_v0  ;;  %787 = vmatpush.msra.mxu3 %v50_v0  ;;  %v48_v2 = vld [vmem:[%s1288_s1] sm:$0xff]  ;;  %v140_v5 = vld [vmem:[#allocation2 + $0x78] sm:$0xff]  ;;  %v139_v6 = vld [vmem:[#allocation2 + $0x70] sm:$0xff] }
   0x7   :  { %v39_v3 = vld [vmem:[%s1287_s0] sm:$0xff]  ;;  %790 = vmatpush.msra.mxu1 %v140_v5  ;;  %v138_v7 = vld [vmem:[#allocation2 + $0x68] sm:$0xff]  ;;  %791 = vmatpush.msra.mxu2 %v140_v5  ;;  %v136_v11 = vld [vmem:[#allocation2 + $0x58] sm:$0xff] }
   0x8   :  { %95 = vmatpush.msra.mxu0 %v49_v1  ;;  %788 = vmatpush.msra.mxu3 %v49_v1  ;;  %v43_v4 = vld [vmem:[%s1287_s0 + $0x20] sm:$0xff]  ;;  %v40_v8 = vld [vmem:[%s1287_s0 + $0x8] sm:$0xff]  ;;  %v135_v12 = vld [vmem:[#allocation2 + $0x50] sm:$0xff] }
   0x9   :  { %792 = vmatpush.msra.mxu1 %v139_v6  ;;  %v137_v9 = vld [vmem:[#allocation2 + $0x60] sm:$0xff]  ;;  %793 = vmatpush.msra.mxu2 %v139_v6  ;;  %v44_v10 = vld [vmem:[%s1287_s0 + $0x28] sm:$0xff]  ;;  %v41_v15 = vld [vmem:[%s1287_s0 + $0x10] sm:$0xff] }
   0xa   :  { %96 = vmatpush.msra.mxu0 %v48_v2  ;;  %789 = vmatpush.msra.mxu3 %v48_v2  ;;  %v134_v13 = vld [vmem:[#allocation2 + $0x48] sm:$0xff]  ;;  %v133_v14 = vld [vmem:[#allocation2 + $0x40] sm:$0xff]  ;;  %v45_v16 = vld [vmem:[%s1287_s0 + $0x30] sm:$0xff] }
   0xb   :  { %778 = vmatmul.msk.f32.vlgmr.msra.gmra.mxu0 %vm53_vm0, %v39_v3  ;;  %782 = vmatmul.msk.f32.vlgmr.msra.gmra.mxu3 %vm53_vm0, %v43_v4  ;;  %v132_v17 = vld [vmem:[#allocation2 + $0x38] sm:$0xff]  ;;  %v131_v18 = vld [vmem:[#allocation2 + $0x30] sm:$0xff]  ;;  %v130_v19 = vld [vmem:[#allocation2 + $0x28] sm:$0xff] }
   0xc   :  { %143 = vmatpush.msrb.mxu0 %v140_v5  ;;  %794 = vmatpush.msra.mxu1 %v138_v7  ;;  %v129_v20 = vld [vmem:[#allocation2 + $0x20] sm:$0xff]  ;;  %v42_v21 = vld [vmem:[%s1287_s0 + $0x18] sm:$0xff]  ;;  %v127_v24 = vld [vmem:[#allocation2 + $0x10] sm:$0xff] }
   0xd   :  { %795 = vmatpush.msra.mxu2 %v138_v7  ;;  %v46_v22 = vld [vmem:[%s1287_s0 + $0x38] sm:$0xff]  ;;  %v126_v25 = vld [vmem:[#allocation2 + $0x8] sm:$0xff]  ;;  %v47_v26 = vld [vmem:[%s1287_s0 + $0x40] sm:$0xff] }
   0xe   :  { %144 = vmatpush.msrb.mxu0 %v139_v6  ;;  %796 = vmatpush.msra.mxu1 %v137_v9  ;;  %v128_v23 = vld [vmem:[#allocation2 + $0x18] sm:$0xff]  ;;  %v125_v27 = vld [vmem:[#allocation2] sm:$0xff]  ;;  %v211_v35 = vld [vmem:[#allocation2 + $0xf0] sm:$0xff] }
   0xf   :  { %797 = vmatpush.msra.mxu2 %v137_v9  ;;  %v841_v28 = vld [vmem:[%s1291_s4] ss:$0 sm:$0xff]  ;;  %v212_v34 = vld [vmem:[#allocation2 + $0xf8] sm:$0xff]  ;;  %v210_v36 = vld [vmem:[#allocation2 + $0xe8] sm:$0xff] }
  0x10   :  { %145 = vmatpush.msrb.mxu0 %v138_v7  ;;  %798 = vmatpush.msra.mxu1 %v136_v11  ;;  %v209_v37 = vld [vmem:[#allocation2 + $0xe0] sm:$0xff]  ;;  %v208_v40 = vld [vmem:[#allocation2 + $0xd8] sm:$0xff]  ;;  %v207_v43 = vld [vmem:[#allocation2 + $0xd0] sm:$0xff] }
  0x11   :  { %799 = vmatpush.msra.mxu2 %v136_v11  ;;  %v206_v44 = vld [vmem:[#allocation2 + $0xc8] sm:$0xff]  ;;  %v205_v45 = vld [vmem:[#allocation2 + $0xc0] sm:$0xff]  ;;  %v204_v48 = vld [vmem:[#allocation2 + $0xb8] sm:$0xff] }
  0x12   :  { %146 = vmatpush.msrb.mxu0 %v137_v9  ;;  %800 = vmatpush.msra.mxu1 %v135_v12  ;;  %v203_v51 = vld [vmem:[#allocation2 + $0xb0] sm:$0xff]  ;;  %v202_v52 = vld [vmem:[#allocation2 + $0xa8] sm:$0xff]  ;;  %v201_v58 = vld [vmem:[#allocation2 + $0xa0] sm:$0xff] }
  0x13   :  { %779 = vmatmul.msk.f32.gmra.mxu0 %vm53_vm0, %v40_v8  ;;  %783 = vmatmul.msk.f32.gmra.mxu3 %vm53_vm0, %v44_v10  ;;  %v200_v59 = vld [vmem:[#allocation2 + $0x98] sm:$0xff]  ;;  %v199_v60 = vld [vmem:[#allocation2 + $0x90] sm:$0xff]  ;;  %v198_v61 = vld [vmem:[#allocation2 + $0x88] sm:$0xff] }
  0x14   :  { %147 = vmatpush.msrb.mxu0 %v136_v11  ;;  %802 = vmatpush.msra.mxu1 %v134_v13  ;;  %v197_v62 = vld [vmem:[#allocation2 + $0x80] sm:$0xff] }
  0x15   :  { %801 = vmatpush.msra.mxu2 %v135_v12  ;;  %v842_v63 = vld [vmem:[%s1291_s4 + $0x1] ss:$0 sm:$0xff] }
  0x16   :  { %148 = vmatpush.msrb.mxu0 %v135_v12  ;;  %804 = vmatpush.msra.mxu1 %v133_v14 }
  0x17   :  { %803 = vmatpush.msra.mxu2 %v134_v13 }
  0x18   :  { %149 = vmatpush.msrb.mxu0 %v134_v13  ;;  %806 = vmatpush.msra.mxu1 %v132_v17 }
  0x19   :  { %805 = vmatpush.msra.mxu2 %v133_v14 }
  0x1a   :  { %150 = vmatpush.msrb.mxu0 %v133_v14  ;;  %808 = vmatpush.msra.mxu1 %v131_v18 }
  0x1b   :  { %780 = vmatmul.msk.f32.gmra.mxu0 %vm53_vm0, %v41_v15  ;;  %784 = vmatmul.msk.f32.gmra.mxu3 %vm53_vm0, %v45_v16 }
  0x1c   :  { %151 = vmatpush.msrb.mxu0 %v132_v17  ;;  %810 = vmatpush.msra.mxu1 %v130_v19 }
  0x1d   :  { %807 = vmatpush.msra.mxu2 %v132_v17 }
  0x1e   :  { %152 = vmatpush.msrb.mxu0 %v131_v18  ;;  %812 = vmatpush.msra.mxu1 %v129_v20 }
  0x1f   :  { %809 = vmatpush.msra.mxu2 %v131_v18  ;;  %v284_v18 = vld [vmem:[#allocation2 + $0x178] sm:$0xff] }
  0x20   :  { %153 = vmatpush.msrb.mxu0 %v130_v19  ;;  %814 = vmatpush.msra.mxu1 %v128_v23 }
  0x21   :  { %811 = vmatpush.msra.mxu2 %v130_v19  ;;  %v283_v19 = vld [vmem:[#allocation2 + $0x170] sm:$0xff]  ;;  %287 = vmatpush.msrb.mxu3 %v284_v18  ;;  %v345_v18 = vld [vmem:[#allocation2 + $0x1a0] sm:$0xff] }
  0x22   :  { %154 = vmatpush.msrb.mxu0 %v129_v20  ;;  %816 = vmatpush.msra.mxu1 %v127_v24 }
  0x23   :  { %781 = vmatmul.msk.f32.gmra.mxu0 %vm53_vm0, %v42_v21  ;;  %785 = vmatmul.msk.f32.gmra.mxu3 %vm53_vm0, %v46_v22  ;;  %v281_v22 = vld [vmem:[#allocation2 + $0x160] sm:$0xff] }
  0x24   :  { %155 = vmatpush.msrb.mxu0 %v128_v23  ;;  %818 = vmatpush.msra.mxu1 %v126_v25 }
  0x25   :  { %813 = vmatpush.msra.mxu2 %v129_v20  ;;  %v282_v20 = vld [vmem:[#allocation2 + $0x168] sm:$0xff]  ;;  %288 = vmatpush.msrb.mxu3 %v283_v19  ;;  %v344_v19 = vld [vmem:[#allocation2 + $0x198] sm:$0xff] }
  0x26   :  { %156 = vmatpush.msrb.mxu0 %v127_v24  ;;  %820 = vmatpush.msra.mxu1 %v125_v27 }
  0x27   :  { %815 = vmatpush.msra.mxu2 %v128_v23  ;;  %289 = vmatpush.msrb.mxu3 %v282_v20  ;;  %v343_v20 = vld [vmem:[#allocation2 + $0x190] sm:$0xff] }
  0x28   :  { %157 = vmatpush.msrb.mxu0 %v126_v25 }
  0x29   :  { %817 = vmatpush.msra.mxu2 %v127_v24  ;;  %290 = vmatpush.msrb.mxu3 %v281_v22  ;;  %v341_v22 = vld [vmem:[#allocation2 + $0x180] sm:$0xff] }
  0x2a   :  { %158 = vmatpush.msrb.mxu0 %v125_v27 }
  0x2b   :  { %786 = vmatmul.msk.f32.gmra.mxu3 %vm53_vm0, %v47_v26  ;;  %819 = vmatpush.msra.mxu2 %v126_v25  ;;  %v280_v25 = vld [vmem:[#allocation2 + $0x158] sm:$0xff]  ;;  %v279_v26 = vld [vmem:[#allocation2 + $0x150] sm:$0xff] }
  0x2c   :  { %291 = vmatpush.msrb.mxu3 %v280_v25 }
  0x2d   :  { %821 = vmatpush.msra.mxu2 %v125_v27  ;;  %v278_v27 = vld [vmem:[#allocation2 + $0x148] sm:$0xff] }
  0x2e   :  { %292 = vmatpush.msrb.mxu3 %v279_v26 }
  0x2f   :  { %215 = vmatpush.msrb.mxu2 %v212_v34  ;;  %v274_v34 = vld [vmem:[#allocation2 + $0x128] sm:$0xff] }
  0x30   :  { %293 = vmatpush.msrb.mxu3 %v278_v27 }
  0x31   :  { %216 = vmatpush.msrb.mxu2 %v211_v35 }
  0x33   :  { %217 = vmatpush.msrb.mxu2 %v210_v36  ;;  %v273_v36 = vld [vmem:[#allocation2 + $0x120] sm:$0xff] }
  0x35   :  { %218 = vmatpush.msrb.mxu2 %v209_v37 }
  0x37   :  { %219 = vmatpush.msrb.mxu2 %v208_v40  ;;  %v271_v40 = vld [vmem:[#allocation2 + $0x110] sm:$0xff] }
  0x39   :  { %220 = vmatpush.msrb.mxu2 %v207_v43  ;;  %v1116_v43 = vld [vmem:[%s1291_s4 + $0x2] ss:$0 sm:$0xff] }
  0x3b   :  { %221 = vmatpush.msrb.mxu2 %v206_v44 }
  0x3d   :  { %222 = vmatpush.msrb.mxu2 %v205_v45 }
  0x3f   :  { %223 = vmatpush.msrb.mxu2 %v204_v48 }
  0x41   :  { %224 = vmatpush.msrb.mxu2 %v203_v51 }
  0x43   :  { %225 = vmatpush.msrb.mxu2 %v202_v52 }
  0x45   :  { %226 = vmatpush.msrb.mxu2 %v201_v58 }
  0x47   :  { %227 = vmatpush.msrb.mxu2 %v200_v59 }
  0x49   :  { %228 = vmatpush.msrb.mxu2 %v199_v60 }
  0x4b   :  { %229 = vmatpush.msrb.mxu2 %v198_v61  ;;  %v356_v61 = vld [vmem:[#allocation2 + $0x1f8] sm:$0xff] }
  0x4c   :  { %359 = vmatpush.msra.mxu0 %v356_v61 }
  0x4d   :  { %230 = vmatpush.msrb.mxu2 %v197_v62  ;;  %v355_v62 = vld [vmem:[#allocation2 + $0x1f0] sm:$0xff] }
  0x4e   :  { %360 = vmatpush.msra.mxu0 %v355_v62  ;;  %v417_v62 = vld [vmem:[#allocation2 + $0x220] sm:$0xff] }
  0x88   :  { %v98_v29 = vpop.f32.mrf.mxu0 }
  0x89   :  { %v99_v30 = vadd.f32 %v841_v28, %v98_v29  ;;  %v277_v29 = vld [vmem:[#allocation2 + $0x140] sm:$0xff] }
  0x8a   :  { %294 = vmatpush.msrb.mxu3 %v277_v29 }
  0x8b   :  { %159 = vmatmul.f32.vlgmr.msrb.gmra.mxu0 %v99_v30 }
  0x8e   :  { %v110_v31 = vpop.f32.mrf.mxu3 }
  0x8f   :  { %v111_v55 = vadd.f32 %v841_v28, %v110_v31  ;;  %v276_v31 = vld [vmem:[#allocation2 + $0x138] sm:$0xff] }
  0x90   :  { %v101_v32 = vpop.f32.mrf.mxu0  ;;  %295 = vmatpush.msrb.mxu3 %v276_v31 }
  0x91   :  { %v102_v33 = vadd.f32 %v841_v28, %v101_v32 }
  0x93   :  { %162 = vmatmul.f32.vlgmr.msra.gmra.mxu1 %v102_v33  ;;  %v275_v33 = vld [vmem:[#allocation2 + $0x130] sm:$0xff] }
  0x94   :  { %296 = vmatpush.msrb.mxu3 %v275_v33 }
  0x96   :  { %v113_v38 = vpop.f32.mrf.mxu3  ;;  %297 = vmatpush.msrb.mxu3 %v274_v34 }
  0x97   :  { %v114_v39 = vadd.f32 %v841_v28, %v113_v38 }
  0x98   :  { %v104_v41 = vpop.f32.mrf.mxu0  ;;  %298 = vmatpush.msrb.mxu3 %v273_v36 }
  0x99   :  { %v105_v42 = vadd.f32 %v841_v28, %v104_v41  ;;  %174 = vmatmul.f32.vlgmr.msra.gmra.mxu2 %v114_v39  ;;  %v272_v39 = vld [vmem:[#allocation2 + $0x118] sm:$0xff]  ;;  %v270_v41 = vld [vmem:[#allocation2 + $0x108] sm:$0xff] }
  0x9a   :  { %299 = vmatpush.msrb.mxu3 %v272_v39 }
  0x9b   :  { %165 = vmatmul.f32.gmra.mxu1 %v105_v42  ;;  %v269_v42 = vld [vmem:[#allocation2 + $0x100] sm:$0xff] }
  0x9c   :  { %300 = vmatpush.msrb.mxu3 %v271_v40 }
  0x9e   :  { %v116_v46 = vpop.f32.mrf.mxu3  ;;  %301 = vmatpush.msrb.mxu3 %v270_v41  ;;  %v428_v41 = vld [vmem:[#allocation2 + $0x278] sm:$0xff] }
  0x9f   :  { %v117_v47 = vadd.f32 %v841_v28, %v116_v46  ;;  %431 = vmatpush.msrb.mxu1 %v428_v41  ;;  %v487_v41 = vld [vmem:[#allocation2 + $0x290] sm:$0xff] }
  0xa0   :  { %v107_v49 = vpop.f32.mrf.mxu0  ;;  %302 = vmatpush.msrb.mxu3 %v269_v42  ;;  %v427_v42 = vld [vmem:[#allocation2 + $0x270] sm:$0xff] }
  0xa1   :  { %v108_v50 = vadd.f32 %v841_v28, %v107_v49  ;;  %177 = vmatmul.f32.gmra.mxu2 %v117_v47  ;;  %432 = vmatpush.msrb.mxu1 %v427_v42 }
  0xa3   :  { %168 = vmatmul.f32.gmra.mxu1 %v108_v50 }
  0xa6   :  { %v119_v53 = vpop.f32.mrf.mxu3 }
  0xa7   :  { %v120_v54 = vadd.f32 %v841_v28, %v119_v53 }
  0xa9   :  { %180 = vmatmul.f32.gmra.mxu2 %v120_v54 }
  0xab   :  { %171 = vmatmul.f32.gmra.mxu1 %v111_v55 }
  0xae   :  { %v122_v56 = vpop.f32.mrf.mxu3 }
  0xaf   :  { %v123_v57 = vadd.f32 %v841_v28, %v122_v56 }
  0xb1   :  { %183 = vmatmul.f32.gmra.mxu2 %v123_v57 }
 0x108   :  { %v160_v0 = vpop.f32.mrf.mxu0 }
 0x109   :  { %v161_v1 = vadd.f32 %v842_v63, %v160_v0  ;;  %v353_v0 = vld [vmem:[#allocation2 + $0x1e0] sm:$0xff] }
 0x10b   :  { %851 = vtanh.f32 %v161_v1 }
 0x110   :  { %v163_v2 = vpop.f32.mrf.mxu1 }
 0x111   :  { %v852_v3 = vpop.eup %851  ;;  %v164_v4 = vadd.f32 %v842_v63, %v163_v2  ;;  %v352_v2 = vld [vmem:[#allocation2 + $0x1d8] sm:$0xff] }
 0x112   :  { %231 = vmatmul.f32.vlgmr.msrb.gmra.mxu2 %v852_v3 }
 0x113   :  { %853 = vtanh.f32 %v164_v4 }
 0x118   :  { %v166_v5 = vpop.f32.mrf.mxu1 }
 0x119   :  { %v854_v6 = vpop.eup %853  ;;  %v167_v7 = vadd.f32 %v842_v63, %v166_v5  ;;  %v351_v5 = vld [vmem:[#allocation2 + $0x1d0] sm:$0xff] }
 0x11a   :  { %234 = vmatmul.f32.gmra.mxu2 %v854_v6  ;;  %v350_v6 = vld [vmem:[#allocation2 + $0x1c8] sm:$0xff] }
 0x11b   :  { %855 = vtanh.f32 %v167_v7  ;;  %v349_v7 = vld [vmem:[#allocation2 + $0x1c0] sm:$0xff] }
 0x11c   :  { %v175_v11 = vpop.f32.mrf.mxu2 }
 0x11d   :  { %v176_v15 = vadd.f32 %v842_v63, %v175_v11 }
 0x120   :  { %v169_v8 = vpop.f32.mrf.mxu1 }
 0x121   :  { %v856_v9 = vpop.eup %855  ;;  %v170_v10 = vadd.f32 %v842_v63, %v169_v8 }
 0x122   :  { %237 = vmatmul.f32.gmra.mxu2 %v856_v9  ;;  %v348_v9 = vld [vmem:[#allocation2 + $0x1b8] sm:$0xff] }
 0x123   :  { %857 = vtanh.f32 %v170_v10 }
 0x124   :  { %v178_v16 = vpop.f32.mrf.mxu2 }
 0x125   :  { %v179_v21 = vadd.f32 %v842_v63, %v178_v16 }
 0x128   :  { %v172_v12 = vpop.f32.mrf.mxu1 }
 0x129   :  { %v858_v13 = vpop.eup %857  ;;  %v173_v14 = vadd.f32 %v842_v63, %v172_v12  ;;  %v347_v12 = vld [vmem:[#allocation2 + $0x1b0] sm:$0xff] }
 0x12a   :  { %240 = vmatmul.f32.gmra.mxu2 %v858_v13  ;;  %v346_v13 = vld [vmem:[#allocation2 + $0x1a8] sm:$0xff] }
 0x12b   :  { %859 = vtanh.f32 %v173_v14 }
 0x12c   :  { %861 = vtanh.f32 %v176_v15  ;;  %v181_v24 = vpop.f32.mrf.mxu2 }
 0x12d   :  { %863 = vtanh.f32 %v179_v21  ;;  %v182_v28 = vadd.f32 %v842_v63, %v181_v24  ;;  %v342_v21 = vld [vmem:[#allocation2 + $0x188] sm:$0xff] }
 0x12f   :  { %865 = vtanh.f32 %v182_v28 }
 0x131   :  { %v860_v17 = vpop.eup %859 }
 0x132   :  { %243 = vmatmul.f32.gmra.mxu2 %v860_v17  ;;  %v862_v23 = vpop.eup %861 }
 0x133   :  { %v864_v30 = vpop.eup %863 }
 0x134   :  { %v184_v32 = vpop.f32.mrf.mxu2 }
 0x135   :  { %v185_v35 = vadd.f32 %v842_v63, %v184_v32  ;;  %v866_v37 = vpop.eup %865  ;;  %v354_v63 = vld [vmem:[#allocation2 + $0x1e8] sm:$0xff] }
 0x136   :  { %361 = vmatpush.msra.mxu0 %v354_v63  ;;  %v416_v63 = vld [vmem:[#allocation2 + $0x218] sm:$0xff] }
 0x137   :  { %867 = vtanh.f32 %v185_v35 }
 0x138   :  { %362 = vmatpush.msra.mxu0 %v353_v0  ;;  %v415_v0 = vld [vmem:[#allocation2 + $0x210] sm:$0xff] }
 0x13a   :  { %246 = vmatmul.f32.gmra.mxu2 %v862_v23  ;;  %363 = vmatpush.msra.mxu0 %v352_v2  ;;  %v1130_v23 = vld [vmem:[%s1291_s4 + $0x3] ss:$0 sm:$0xff] }
 0x13b   :  { %v413_v2 = vld [vmem:[#allocation2 + $0x200] sm:$0xff] }
 0x13c   :  { %364 = vmatpush.msra.mxu0 %v351_v5 }
 0x13d   :  { %v868_v38 = vpop.eup %867 }
 0x13e   :  { %365 = vmatpush.msra.mxu0 %v350_v6 }
 0x140   :  { %366 = vmatpush.msra.mxu0 %v349_v7 }
 0x142   :  { %249 = vmatmul.f32.gmra.mxu2 %v864_v30  ;;  %367 = vmatpush.msra.mxu0 %v348_v9 }
 0x144   :  { %368 = vmatpush.msra.mxu0 %v347_v12 }
 0x146   :  { %369 = vmatpush.msra.mxu0 %v346_v13 }
 0x148   :  { %370 = vmatpush.msra.mxu0 %v345_v18  ;;  %v500_v18 = vld [vmem:[#allocation2 + $0x2f8] sm:$0xff] }
 0x149   :  { %503 = vmatpush.msra.mxu2 %v500_v18  ;;  %v561_v18 = vld [vmem:[#allocation2 + $0x320] sm:$0xff] }
 0x14a   :  { %252 = vmatmul.f32.gmra.mxu2 %v866_v37  ;;  %371 = vmatpush.msra.mxu0 %v344_v19 }
 0x14c   :  { %372 = vmatpush.msra.mxu0 %v343_v20 }
 0x14e   :  { %373 = vmatpush.msra.mxu0 %v342_v21 }
 0x150   :  { %374 = vmatpush.msra.mxu0 %v341_v22  ;;  %v499_v22 = vld [vmem:[#allocation2 + $0x2f0] sm:$0xff] }
 0x151   :  { %504 = vmatpush.msra.mxu2 %v499_v22 }
 0x152   :  { %255 = vmatmul.f32.gmra.mxu2 %v868_v38 }
 0x195   :  { %v232_v44 = vpop.f32.mrf.mxu2 }
 0x196   :  { %v233_v45 = vadd.f32 %v1116_v43, %v232_v44  ;;  %v425_v44 = vld [vmem:[#allocation2 + $0x260] sm:$0xff] }
 0x198   :  { %869 = vtanh.f32 %v233_v45 }
 0x19d   :  { %v235_v46 = vpop.f32.mrf.mxu2 }
 0x19e   :  { %v870_v47 = vpop.eup %869  ;;  %v236_v48 = vadd.f32 %v1116_v43, %v235_v46  ;;  %v424_v46 = vld [vmem:[#allocation2 + $0x258] sm:$0xff] }
 0x19f   :  { %303 = vmatmul.f32.vlgmr.msrb.gmra.mxu3 %v870_v47 }
 0x1a0   :  { %871 = vtanh.f32 %v236_v48 }
 0x1a5   :  { %v238_v49 = vpop.f32.mrf.mxu2 }
 0x1a6   :  { %v872_v50 = vpop.eup %871  ;;  %v239_v51 = vadd.f32 %v1116_v43, %v238_v49  ;;  %v423_v49 = vld [vmem:[#allocation2 + $0x250] sm:$0xff] }
 0x1a7   :  { %306 = vmatmul.f32.gmra.mxu3 %v872_v50  ;;  %v422_v50 = vld [vmem:[#allocation2 + $0x248] sm:$0xff] }
 0x1a8   :  { %873 = vtanh.f32 %v239_v51  ;;  %v421_v51 = vld [vmem:[#allocation2 + $0x240] sm:$0xff] }
 0x1ad   :  { %v241_v52 = vpop.f32.mrf.mxu2 }
 0x1ae   :  { %v874_v53 = vpop.eup %873  ;;  %v242_v54 = vadd.f32 %v1116_v43, %v241_v52 }
 0x1af   :  { %309 = vmatmul.f32.gmra.mxu3 %v874_v53  ;;  %v420_v53 = vld [vmem:[#allocation2 + $0x238] sm:$0xff] }
 0x1b0   :  { %875 = vtanh.f32 %v242_v54 }
 0x1b5   :  { %v244_v55 = vpop.f32.mrf.mxu2 }
 0x1b6   :  { %v876_v56 = vpop.eup %875  ;;  %v245_v57 = vadd.f32 %v1116_v43, %v244_v55 }
 0x1b7   :  { %312 = vmatmul.f32.gmra.mxu3 %v876_v56  ;;  %v419_v56 = vld [vmem:[#allocation2 + $0x230] sm:$0xff] }
 0x1b8   :  { %877 = vtanh.f32 %v245_v57  ;;  %v418_v57 = vld [vmem:[#allocation2 + $0x228] sm:$0xff] }
 0x1bd   :  { %v247_v58 = vpop.f32.mrf.mxu2 }
 0x1be   :  { %v878_v59 = vpop.eup %877  ;;  %v248_v60 = vadd.f32 %v1116_v43, %v247_v58 }
 0x1bf   :  { %315 = vmatmul.f32.gmra.mxu3 %v878_v59 }
 0x1c0   :  { %879 = vtanh.f32 %v248_v60 }
 0x1c5   :  { %v250_v1 = vpop.f32.mrf.mxu2 }
 0x1c6   :  { %v880_v3 = vpop.eup %879  ;;  %v251_v4 = vadd.f32 %v1116_v43, %v250_v1  ;;  %v414_v1 = vld [vmem:[#allocation2 + $0x208] sm:$0xff] }
 0x1c7   :  { %318 = vmatmul.f32.gmra.mxu3 %v880_v3  ;;  %v1144_v3 = vld [vmem:[%s1291_s4 + $0x4] ss:$0 sm:$0xff] }
 0x1c8   :  { %881 = vtanh.f32 %v251_v4 }
 0x1cd   :  { %v253_v8 = vpop.f32.mrf.mxu2 }
 0x1ce   :  { %v882_v10 = vpop.eup %881  ;;  %v254_v11 = vadd.f32 %v1116_v43, %v253_v8 }
 0x1cf   :  { %321 = vmatmul.f32.gmra.mxu3 %v882_v10 }
 0x1d0   :  { %883 = vtanh.f32 %v254_v11 }
 0x1d5   :  { %v256_v14 = vpop.f32.mrf.mxu2 }
 0x1d6   :  { %v884_v15 = vpop.eup %883  ;;  %v257_v16 = vadd.f32 %v1116_v43, %v256_v14  ;;  %v426_v43 = vld [vmem:[#allocation2 + $0x268] sm:$0xff] }
 0x1d7   :  { %324 = vmatmul.f32.gmra.mxu3 %v884_v15  ;;  %433 = vmatpush.msrb.mxu1 %v426_v43 }
 0x1d8   :  { %885 = vtanh.f32 %v257_v16 }
 0x1d9   :  { %434 = vmatpush.msrb.mxu1 %v425_v44 }
 0x1db   :  { %435 = vmatpush.msrb.mxu1 %v424_v46  ;;  %v485_v46 = vld [vmem:[#allocation2 + $0x280] sm:$0xff] }
 0x1dd   :  { %436 = vmatpush.msrb.mxu1 %v423_v49 }
 0x1de   :  { %v886_v17 = vpop.eup %885 }
 0x1df   :  { %327 = vmatmul.f32.gmra.mxu3 %v886_v17  ;;  %437 = vmatpush.msrb.mxu1 %v422_v50 }
 0x1e1   :  { %438 = vmatpush.msrb.mxu1 %v421_v51 }
 0x1e3   :  { %439 = vmatpush.msrb.mxu1 %v420_v53 }
 0x1e5   :  { %440 = vmatpush.msrb.mxu1 %v419_v56 }
 0x1e7   :  { %441 = vmatpush.msrb.mxu1 %v418_v57 }
 0x1e9   :  { %442 = vmatpush.msrb.mxu1 %v417_v62 }
 0x1eb   :  { %443 = vmatpush.msrb.mxu1 %v416_v63 }
 0x1ed   :  { %444 = vmatpush.msrb.mxu1 %v415_v0 }
 0x1ef   :  { %445 = vmatpush.msrb.mxu1 %v414_v1  ;;  %v572_v1 = vld [vmem:[#allocation2 + $0x378] sm:$0xff] }
 0x1f0   :  { %575 = vmatpush.msra.mxu3 %v572_v1 }
 0x1f1   :  { %446 = vmatpush.msrb.mxu1 %v413_v2  ;;  %v571_v2 = vld [vmem:[#allocation2 + $0x370] sm:$0xff] }
 0x1f2   :  { %576 = vmatpush.msra.mxu3 %v571_v2 }
 0x222   :  { %v304_v24 = vpop.f32.mrf.mxu3 }
 0x223   :  { %v305_v25 = vadd.f32 %v1130_v23, %v304_v24  ;;  %v497_v24 = vld [vmem:[#allocation2 + $0x2e0] sm:$0xff] }
 0x225   :  { %887 = vtanh.f32 %v305_v25  ;;  %v496_v25 = vld [vmem:[#allocation2 + $0x2d8] sm:$0xff] }
 0x22a   :  { %v307_v26 = vpop.f32.mrf.mxu3 }
 0x22b   :  { %v888_v27 = vpop.eup %887  ;;  %v308_v28 = vadd.f32 %v1130_v23, %v307_v26 }
 0x22c   :  { %375 = vmatmul.f32.vlgmr.msra.gmra.mxu0 %v888_v27  ;;  %v495_v27 = vld [vmem:[#allocation2 + $0x2d0] sm:$0xff] }
 0x22d   :  { %889 = vtanh.f32 %v308_v28 }
 0x232   :  { %v310_v29 = vpop.f32.mrf.mxu3 }
 0x233   :  { %v890_v30 = vpop.eup %889  ;;  %v311_v31 = vadd.f32 %v1130_v23, %v310_v29 }
 0x234   :  { %378 = vmatmul.f32.gmra.mxu0 %v890_v30  ;;  %v494_v30 = vld [vmem:[#allocation2 + $0x2c8] sm:$0xff] }
 0x235   :  { %891 = vtanh.f32 %v311_v31  ;;  %v493_v31 = vld [vmem:[#allocation2 + $0x2c0] sm:$0xff] }
 0x23a   :  { %v313_v32 = vpop.f32.mrf.mxu3 }
 0x23b   :  { %v892_v33 = vpop.eup %891  ;;  %v314_v34 = vadd.f32 %v1130_v23, %v313_v32  ;;  %v492_v32 = vld [vmem:[#allocation2 + $0x2b8] sm:$0xff] }
 0x23c   :  { %381 = vmatmul.f32.gmra.mxu0 %v892_v33 }
 0x23d   :  { %893 = vtanh.f32 %v314_v34  ;;  %v491_v34 = vld [vmem:[#allocation2 + $0x2b0] sm:$0xff] }
 0x242   :  { %v316_v35 = vpop.f32.mrf.mxu3 }
 0x243   :  { %v894_v36 = vpop.eup %893  ;;  %v317_v37 = vadd.f32 %v1130_v23, %v316_v35 }
 0x244   :  { %384 = vmatmul.f32.gmra.mxu0 %v894_v36 }
 0x245   :  { %895 = vtanh.f32 %v317_v37  ;;  %v490_v37 = vld [vmem:[#allocation2 + $0x2a8] sm:$0xff] }
 0x24a   :  { %v319_v38 = vpop.f32.mrf.mxu3 }
 0x24b   :  { %v896_v39 = vpop.eup %895  ;;  %v320_v40 = vadd.f32 %v1130_v23, %v319_v38  ;;  %v489_v38 = vld [vmem:[#allocation2 + $0x2a0] sm:$0xff] }
 0x24c   :  { %387 = vmatmul.f32.gmra.mxu0 %v896_v39  ;;  %v488_v39 = vld [vmem:[#allocation2 + $0x298] sm:$0xff] }
 0x24d   :  { %897 = vtanh.f32 %v320_v40 }
 0x252   :  { %v322_v45 = vpop.f32.mrf.mxu3 }
 0x253   :  { %v898_v47 = vpop.eup %897  ;;  %v323_v48 = vadd.f32 %v1130_v23, %v322_v45  ;;  %v486_v45 = vld [vmem:[#allocation2 + $0x288] sm:$0xff] }
 0x254   :  { %390 = vmatmul.f32.gmra.mxu0 %v898_v47  ;;  %v1158_v47 = vld [vmem:[%s1291_s4 + $0x5] ss:$0 sm:$0xff] }
 0x255   :  { %899 = vtanh.f32 %v323_v48 }
 0x25a   :  { %v325_v52 = vpop.f32.mrf.mxu3 }
 0x25b   :  { %v900_v54 = vpop.eup %899  ;;  %v326_v55 = vadd.f32 %v1130_v23, %v325_v52 }
 0x25c   :  { %393 = vmatmul.f32.gmra.mxu0 %v900_v54 }
 0x25d   :  { %901 = vtanh.f32 %v326_v55 }
 0x262   :  { %v328_v58 = vpop.f32.mrf.mxu3 }
 0x263   :  { %v902_v59 = vpop.eup %901  ;;  %v329_v60 = vadd.f32 %v1130_v23, %v328_v58  ;;  %v498_v23 = vld [vmem:[#allocation2 + $0x2e8] sm:$0xff] }
 0x264   :  { %396 = vmatmul.f32.gmra.mxu0 %v902_v59  ;;  %505 = vmatpush.msra.mxu2 %v498_v23  ;;  %v559_v23 = vld [vmem:[#allocation2 + $0x310] sm:$0xff] }
 0x265   :  { %903 = vtanh.f32 %v329_v60 }
 0x266   :  { %506 = vmatpush.msra.mxu2 %v497_v24 }
 0x268   :  { %507 = vmatpush.msra.mxu2 %v496_v25  ;;  %v558_v25 = vld [vmem:[#allocation2 + $0x308] sm:$0xff] }
 0x26a   :  { %508 = vmatpush.msra.mxu2 %v495_v27  ;;  %v1172_v27 = vld [vmem:[%s1291_s4 + $0x6] ss:$0 sm:$0xff] }
 0x26b   :  { %v904_v61 = vpop.eup %903 }
 0x26c   :  { %399 = vmatmul.f32.gmra.mxu0 %v904_v61  ;;  %509 = vmatpush.msra.mxu2 %v494_v30 }
 0x26e   :  { %510 = vmatpush.msra.mxu2 %v493_v31 }
 0x270   :  { %511 = vmatpush.msra.mxu2 %v492_v32 }
 0x272   :  { %512 = vmatpush.msra.mxu2 %v491_v34 }
 0x274   :  { %513 = vmatpush.msra.mxu2 %v490_v37 }
 0x276   :  { %514 = vmatpush.msra.mxu2 %v489_v38 }
 0x278   :  { %515 = vmatpush.msra.mxu2 %v488_v39 }
 0x27a   :  { %516 = vmatpush.msra.mxu2 %v487_v41 }
 0x27c   :  { %517 = vmatpush.msra.mxu2 %v486_v45  ;;  %v644_v45 = vld [vmem:[#allocation2 + $0x3f8] sm:$0xff] }
 0x27d   :  { %647 = vmatpush.msrb.mxu0 %v644_v45 }
 0x27e   :  { %518 = vmatpush.msra.mxu2 %v485_v46  ;;  %v643_v46 = vld [vmem:[#allocation2 + $0x3f0] sm:$0xff] }
 0x27f   :  { %648 = vmatpush.msrb.mxu0 %v643_v46 }
 0x2a9   :  { %v376_v4 = vpop.f32.mrf.mxu0 }
 0x2aa   :  { %v377_v5 = vadd.f32 %v1144_v3, %v376_v4  ;;  %v569_v4 = vld [vmem:[#allocation2 + $0x360] sm:$0xff] }
 0x2ac   :  { %905 = vtanh.f32 %v377_v5 }
 0x2b1   :  { %v379_v6 = vpop.f32.mrf.mxu0 }
 0x2b2   :  { %v906_v7 = vpop.eup %905  ;;  %v380_v8 = vadd.f32 %v1144_v3, %v379_v6  ;;  %v568_v6 = vld [vmem:[#allocation2 + $0x358] sm:$0xff] }
 0x2b3   :  { %447 = vmatmul.f32.vlgmr.msrb.gmra.mxu1 %v906_v7 }
 0x2b4   :  { %907 = vtanh.f32 %v380_v8 }
 0x2b9   :  { %v382_v9 = vpop.f32.mrf.mxu0 }
 0x2ba   :  { %v908_v10 = vpop.eup %907  ;;  %v383_v11 = vadd.f32 %v1144_v3, %v382_v9  ;;  %v567_v9 = vld [vmem:[#allocation2 + $0x350] sm:$0xff] }
 0x2bb   :  { %450 = vmatmul.f32.gmra.mxu1 %v908_v10  ;;  %v566_v10 = vld [vmem:[#allocation2 + $0x348] sm:$0xff] }
 0x2bc   :  { %909 = vtanh.f32 %v383_v11  ;;  %v565_v11 = vld [vmem:[#allocation2 + $0x340] sm:$0xff] }
 0x2c1   :  { %v385_v12 = vpop.f32.mrf.mxu0 }
 0x2c2   :  { %v910_v13 = vpop.eup %909  ;;  %v386_v14 = vadd.f32 %v1144_v3, %v385_v12 }
 0x2c3   :  { %453 = vmatmul.f32.gmra.mxu1 %v910_v13  ;;  %v564_v13 = vld [vmem:[#allocation2 + $0x338] sm:$0xff] }
 0x2c4   :  { %911 = vtanh.f32 %v386_v14 }
 0x2c9   :  { %v388_v15 = vpop.f32.mrf.mxu0 }
 0x2ca   :  { %v912_v16 = vpop.eup %911  ;;  %v389_v17 = vadd.f32 %v1144_v3, %v388_v15 }
 0x2cb   :  { %456 = vmatmul.f32.gmra.mxu1 %v912_v16  ;;  %v563_v16 = vld [vmem:[#allocation2 + $0x330] sm:$0xff] }
 0x2cc   :  { %913 = vtanh.f32 %v389_v17  ;;  %v562_v17 = vld [vmem:[#allocation2 + $0x328] sm:$0xff] }
 0x2d1   :  { %v391_v19 = vpop.f32.mrf.mxu0 }
 0x2d2   :  { %v914_v20 = vpop.eup %913  ;;  %v392_v21 = vadd.f32 %v1144_v3, %v391_v19 }
 0x2d3   :  { %459 = vmatmul.f32.gmra.mxu1 %v914_v20  ;;  %v560_v20 = vld [vmem:[#allocation2 + $0x318] sm:$0xff] }
 0x2d4   :  { %915 = vtanh.f32 %v392_v21 }
 0x2d9   :  { %v394_v26 = vpop.f32.mrf.mxu0 }
 0x2da   :  { %v916_v28 = vpop.eup %915  ;;  %v395_v29 = vadd.f32 %v1144_v3, %v394_v26  ;;  %v557_v26 = vld [vmem:[#allocation2 + $0x300] sm:$0xff] }
 0x2db   :  { %462 = vmatmul.f32.gmra.mxu1 %v916_v28 }
 0x2dc   :  { %917 = vtanh.f32 %v395_v29 }
 0x2e1   :  { %v397_v33 = vpop.f32.mrf.mxu0 }
 0x2e2   :  { %v918_v35 = vpop.eup %917  ;;  %v398_v36 = vadd.f32 %v1144_v3, %v397_v33 }
 0x2e3   :  { %465 = vmatmul.f32.gmra.mxu1 %v918_v35 }
 0x2e4   :  { %919 = vtanh.f32 %v398_v36 }
 0x2e9   :  { %v400_v40 = vpop.f32.mrf.mxu0 }
 0x2ea   :  { %v920_v42 = vpop.eup %919  ;;  %v401_v43 = vadd.f32 %v1144_v3, %v400_v40  ;;  %v570_v3 = vld [vmem:[#allocation2 + $0x368] sm:$0xff] }
 0x2eb   :  { %468 = vmatmul.f32.gmra.mxu1 %v920_v42  ;;  %577 = vmatpush.msra.mxu3 %v570_v3 }
 0x2ec   :  { %921 = vtanh.f32 %v401_v43 }
 0x2ed   :  { %578 = vmatpush.msra.mxu3 %v569_v4  ;;  %v631_v4 = vld [vmem:[#allocation2 + $0x390] sm:$0xff] }
 0x2ef   :  { %579 = vmatpush.msra.mxu3 %v568_v6  ;;  %v629_v6 = vld [vmem:[#allocation2 + $0x380] sm:$0xff] }
 0x2f1   :  { %580 = vmatpush.msra.mxu3 %v567_v9 }
 0x2f2   :  { %v922_v44 = vpop.eup %921 }
 0x2f3   :  { %471 = vmatmul.f32.gmra.mxu1 %v922_v44  ;;  %581 = vmatpush.msra.mxu3 %v566_v10 }
 0x2f5   :  { %582 = vmatpush.msra.mxu3 %v565_v11 }
 0x2f7   :  { %583 = vmatpush.msra.mxu3 %v564_v13 }
 0x2f9   :  { %584 = vmatpush.msra.mxu3 %v563_v16 }
 0x2fb   :  { %585 = vmatpush.msra.mxu3 %v562_v17 }
 0x2fd   :  { %586 = vmatpush.msra.mxu3 %v561_v18 }
 0x2ff   :  { %587 = vmatpush.msra.mxu3 %v560_v20 }
 0x301   :  { %588 = vmatpush.msra.mxu3 %v559_v23 }
 0x303   :  { %589 = vmatpush.msra.mxu3 %v558_v25  ;;  %v715_v25 = vld [vmem:[%s1290_s3 + $0x78] sm:$0xff] }
 0x304   :  { %720 = vmatpush.msra.mxu1 %v715_v25 }
 0x305   :  { %590 = vmatpush.msra.mxu3 %v557_v26  ;;  %v714_v26 = vld [vmem:[%s1290_s3 + $0x70] sm:$0xff] }
 0x306   :  { %721 = vmatpush.msra.mxu1 %v714_v26 }
 0x307   :  { %822 = vmatpush.msrb.mxu3 %v644_v45 }
 0x309   :  { %823 = vmatpush.msrb.mxu3 %v643_v46 }
 0x330   :  { %v448_v48 = vpop.f32.mrf.mxu1 }
 0x331   :  { %v449_v49 = vadd.f32 %v1158_v47, %v448_v48  ;;  %v641_v48 = vld [vmem:[#allocation2 + $0x3e0] sm:$0xff] }
 0x333   :  { %923 = vtanh.f32 %v449_v49 }
 0x338   :  { %v451_v50 = vpop.f32.mrf.mxu1 }
 0x339   :  { %v924_v51 = vpop.eup %923  ;;  %v452_v52 = vadd.f32 %v1158_v47, %v451_v50  ;;  %v640_v50 = vld [vmem:[#allocation2 + $0x3d8] sm:$0xff] }
 0x33a   :  { %519 = vmatmul.f32.vlgmr.msra.gmra.mxu2 %v924_v51 }
 0x33b   :  { %925 = vtanh.f32 %v452_v52 }
 0x340   :  { %v454_v53 = vpop.f32.mrf.mxu1 }
 0x341   :  { %v926_v54 = vpop.eup %925  ;;  %v455_v55 = vadd.f32 %v1158_v47, %v454_v53  ;;  %v639_v53 = vld [vmem:[#allocation2 + $0x3d0] sm:$0xff] }
 0x342   :  { %522 = vmatmul.f32.gmra.mxu2 %v926_v54  ;;  %v638_v54 = vld [vmem:[#allocation2 + $0x3c8] sm:$0xff] }
 0x343   :  { %927 = vtanh.f32 %v455_v55  ;;  %v637_v55 = vld [vmem:[#allocation2 + $0x3c0] sm:$0xff] }
 0x348   :  { %v457_v56 = vpop.f32.mrf.mxu1 }
 0x349   :  { %v928_v57 = vpop.eup %927  ;;  %v458_v58 = vadd.f32 %v1158_v47, %v457_v56 }
 0x34a   :  { %525 = vmatmul.f32.gmra.mxu2 %v928_v57  ;;  %v636_v57 = vld [vmem:[#allocation2 + $0x3b8] sm:$0xff] }
 0x34b   :  { %929 = vtanh.f32 %v458_v58 }
 0x350   :  { %v460_v59 = vpop.f32.mrf.mxu1 }
 0x351   :  { %v930_v60 = vpop.eup %929  ;;  %v461_v61 = vadd.f32 %v1158_v47, %v460_v59 }
 0x352   :  { %528 = vmatmul.f32.gmra.mxu2 %v930_v60  ;;  %v635_v60 = vld [vmem:[#allocation2 + $0x3b0] sm:$0xff] }
 0x353   :  { %931 = vtanh.f32 %v461_v61  ;;  %v634_v61 = vld [vmem:[#allocation2 + $0x3a8] sm:$0xff] }
 0x358   :  { %v463_v62 = vpop.f32.mrf.mxu1 }
 0x359   :  { %v932_v63 = vpop.eup %931  ;;  %v464_v0 = vadd.f32 %v1158_v47, %v463_v62  ;;  %v633_v62 = vld [vmem:[#allocation2 + $0x3a0] sm:$0xff] }
 0x35a   :  { %531 = vmatmul.f32.gmra.mxu2 %v932_v63 }
 0x35b   :  { %933 = vtanh.f32 %v464_v0  ;;  %v632_v0 = vld [vmem:[#allocation2 + $0x398] sm:$0xff] }
 0x360   :  { %v466_v5 = vpop.f32.mrf.mxu1 }
 0x361   :  { %v934_v7 = vpop.eup %933  ;;  %v467_v8 = vadd.f32 %v1158_v47, %v466_v5  ;;  %v630_v5 = vld [vmem:[#allocation2 + $0x388] sm:$0xff] }
 0x362   :  { %534 = vmatmul.f32.gmra.mxu2 %v934_v7  ;;  %v1186_v7 = vld [vmem:[%s1291_s4 + $0x7] ss:$0 sm:$0xff] }
 0x363   :  { %935 = vtanh.f32 %v467_v8 }
 0x368   :  { %v469_v12 = vpop.f32.mrf.mxu1 }
 0x369   :  { %v936_v14 = vpop.eup %935  ;;  %v470_v15 = vadd.f32 %v1158_v47, %v469_v12 }
 0x36a   :  { %537 = vmatmul.f32.gmra.mxu2 %v936_v14 }
 0x36b   :  { %937 = vtanh.f32 %v470_v15 }
 0x370   :  { %v472_v19 = vpop.f32.mrf.mxu1 }
 0x371   :  { %v938_v21 = vpop.eup %937  ;;  %v473_v22 = vadd.f32 %v1158_v47, %v472_v19  ;;  %v642_v47 = vld [vmem:[#allocation2 + $0x3e8] sm:$0xff] }
 0x372   :  { %540 = vmatmul.f32.gmra.mxu2 %v938_v21  ;;  %649 = vmatpush.msrb.mxu0 %v642_v47 }
 0x373   :  { %939 = vtanh.f32 %v473_v22  ;;  %824 = vmatpush.msrb.mxu3 %v642_v47 }
 0x374   :  { %650 = vmatpush.msrb.mxu0 %v641_v48 }
 0x375   :  { %825 = vmatpush.msrb.mxu3 %v641_v48  ;;  %v702_v48 = vld [vmem:[%s1290_s3 + $0x10] sm:$0xff] }
 0x376   :  { %651 = vmatpush.msrb.mxu0 %v640_v50 }
 0x377   :  { %826 = vmatpush.msrb.mxu3 %v640_v50  ;;  %v700_v50 = vld [vmem:[%s1290_s3] sm:$0xff] }
 0x378   :  { %652 = vmatpush.msrb.mxu0 %v639_v53 }
 0x379   :  { %v940_v24 = vpop.eup %939  ;;  %827 = vmatpush.msrb.mxu3 %v639_v53 }
 0x37a   :  { %543 = vmatmul.f32.gmra.mxu2 %v940_v24  ;;  %653 = vmatpush.msrb.mxu0 %v638_v54 }
 0x37b   :  { %828 = vmatpush.msrb.mxu3 %v638_v54 }
 0x37c   :  { %654 = vmatpush.msrb.mxu0 %v637_v55 }
 0x37d   :  { %829 = vmatpush.msrb.mxu3 %v637_v55 }
 0x37e   :  { %655 = vmatpush.msrb.mxu0 %v636_v57 }
 0x37f   :  { %830 = vmatpush.msrb.mxu3 %v636_v57 }
 0x380   :  { %656 = vmatpush.msrb.mxu0 %v635_v60 }
 0x381   :  { %831 = vmatpush.msrb.mxu3 %v635_v60 }
 0x382   :  { %657 = vmatpush.msrb.mxu0 %v634_v61 }
 0x383   :  { %832 = vmatpush.msrb.mxu3 %v634_v61 }
 0x384   :  { %658 = vmatpush.msrb.mxu0 %v633_v62 }
 0x385   :  { %833 = vmatpush.msrb.mxu3 %v633_v62 }
 0x386   :  { %659 = vmatpush.msrb.mxu0 %v632_v0 }
 0x387   :  { %834 = vmatpush.msrb.mxu3 %v632_v0 }
 0x388   :  { %660 = vmatpush.msrb.mxu0 %v631_v4 }
 0x389   :  { %835 = vmatpush.msrb.mxu3 %v631_v4 }
 0x38a   :  { %661 = vmatpush.msrb.mxu0 %v630_v5 }
 0x38b   :  { %836 = vmatpush.msrb.mxu3 %v630_v5 }
 0x38c   :  { %662 = vmatpush.msrb.mxu0 %v629_v6 }
 0x38d   :  { %837 = vmatpush.msrb.mxu3 %v629_v6 }
 0x3bd   :  { %v520_v28 = vpop.f32.mrf.mxu2 }
 0x3be   :  { %v521_v29 = vadd.f32 %v1172_v27, %v520_v28  ;;  %v712_v28 = vld [vmem:[%s1290_s3 + $0x60] sm:$0xff] }
 0x3c0   :  { %941 = vtanh.f32 %v521_v29 }
 0x3c5   :  { %v523_v30 = vpop.f32.mrf.mxu2 }
 0x3c6   :  { %v942_v31 = vpop.eup %941  ;;  %v524_v32 = vadd.f32 %v1172_v27, %v523_v30  ;;  %v711_v30 = vld [vmem:[%s1290_s3 + $0x58] sm:$0xff] }
 0x3c7   :  { %591 = vmatmul.f32.vlgmr.msra.gmra.mxu3 %v942_v31 }
 0x3c8   :  { %943 = vtanh.f32 %v524_v32 }
 0x3cd   :  { %v526_v33 = vpop.f32.mrf.mxu2 }
 0x3ce   :  { %v944_v34 = vpop.eup %943  ;;  %v527_v35 = vadd.f32 %v1172_v27, %v526_v33  ;;  %v710_v33 = vld [vmem:[%s1290_s3 + $0x50] sm:$0xff] }
 0x3cf   :  { %594 = vmatmul.f32.gmra.mxu3 %v944_v34  ;;  %v709_v34 = vld [vmem:[%s1290_s3 + $0x48] sm:$0xff] }
 0x3d0   :  { %945 = vtanh.f32 %v527_v35  ;;  %v708_v35 = vld [vmem:[%s1290_s3 + $0x40] sm:$0xff] }
 0x3d5   :  { %v529_v36 = vpop.f32.mrf.mxu2 }
 0x3d6   :  { %v946_v37 = vpop.eup %945  ;;  %v530_v38 = vadd.f32 %v1172_v27, %v529_v36 }
 0x3d7   :  { %597 = vmatmul.f32.gmra.mxu3 %v946_v37  ;;  %v707_v37 = vld [vmem:[%s1290_s3 + $0x38] sm:$0xff] }
 0x3d8   :  { %947 = vtanh.f32 %v530_v38 }
 0x3dd   :  { %v532_v39 = vpop.f32.mrf.mxu2 }
 0x3de   :  { %v948_v40 = vpop.eup %947  ;;  %v533_v41 = vadd.f32 %v1172_v27, %v532_v39 }
 0x3df   :  { %600 = vmatmul.f32.gmra.mxu3 %v948_v40  ;;  %v706_v40 = vld [vmem:[%s1290_s3 + $0x30] sm:$0xff] }
 0x3e0   :  { %949 = vtanh.f32 %v533_v41  ;;  %v705_v41 = vld [vmem:[%s1290_s3 + $0x28] sm:$0xff] }
 0x3e5   :  { %v535_v42 = vpop.f32.mrf.mxu2 }
 0x3e6   :  { %v950_v43 = vpop.eup %949  ;;  %v536_v44 = vadd.f32 %v1172_v27, %v535_v42  ;;  %v704_v42 = vld [vmem:[%s1290_s3 + $0x20] sm:$0xff] }
 0x3e7   :  { %603 = vmatmul.f32.gmra.mxu3 %v950_v43 }
 0x3e8   :  { %951 = vtanh.f32 %v536_v44  ;;  %v703_v44 = vld [vmem:[%s1290_s3 + $0x18] sm:$0xff] }
 0x3ed   :  { %v538_v49 = vpop.f32.mrf.mxu2 }
 0x3ee   :  { %v952_v51 = vpop.eup %951  ;;  %v539_v52 = vadd.f32 %v1172_v27, %v538_v49  ;;  %v701_v49 = vld [vmem:[%s1290_s3 + $0x8] sm:$0xff] }
 0x3ef   :  { %606 = vmatmul.f32.gmra.mxu3 %v952_v51  ;;  %v849_v51 = vld [vmem:[%s1291_s4 + $0x8] ss:$0 sm:$0xff] }
 0x3f0   :  { %953 = vtanh.f32 %v539_v52 }
 0x3f5   :  { %v541_v56 = vpop.f32.mrf.mxu2 }
 0x3f6   :  { %v954_v58 = vpop.eup %953  ;;  %v542_v59 = vadd.f32 %v1172_v27, %v541_v56 }
 0x3f7   :  { %609 = vmatmul.f32.gmra.mxu3 %v954_v58 }
 0x3f8   :  { %955 = vtanh.f32 %v542_v59 }
 0x3fd   :  { %v544_v63 = vpop.f32.mrf.mxu2 }
 0x3fe   :  { %v956_v1 = vpop.eup %955  ;;  %v545_v2 = vadd.f32 %v1172_v27, %v544_v63  ;;  %v713_v27 = vld [vmem:[%s1290_s3 + $0x68] sm:$0xff] }
 0x3ff   :  { %612 = vmatmul.f32.gmra.mxu3 %v956_v1  ;;  %722 = vmatpush.msra.mxu1 %v713_v27 }
 0x400   :  { %957 = vtanh.f32 %v545_v2 }
 0x401   :  { %723 = vmatpush.msra.mxu1 %v712_v28 }
 0x403   :  { %724 = vmatpush.msra.mxu1 %v711_v30 }
 0x405   :  { %725 = vmatpush.msra.mxu1 %v710_v33 }
 0x406   :  { %v958_v3 = vpop.eup %957 }
 0x407   :  { %615 = vmatmul.f32.gmra.mxu3 %v958_v3  ;;  %726 = vmatpush.msra.mxu1 %v709_v34 }
 0x409   :  { %727 = vmatpush.msra.mxu1 %v708_v35 }
 0x40b   :  { %728 = vmatpush.msra.mxu1 %v707_v37 }
 0x40d   :  { %729 = vmatpush.msra.mxu1 %v706_v40 }
 0x40f   :  { %730 = vmatpush.msra.mxu1 %v705_v41 }
 0x411   :  { %731 = vmatpush.msra.mxu1 %v704_v42 }
 0x413   :  { %732 = vmatpush.msra.mxu1 %v703_v44 }
 0x415   :  { %733 = vmatpush.msra.mxu1 %v702_v48 }
 0x417   :  { %734 = vmatpush.msra.mxu1 %v701_v49 }
 0x419   :  { %735 = vmatpush.msra.mxu1 %v700_v50 }
 0x44a   :  { %v592_v8 = vpop.f32.mrf.mxu3 }
 0x44b   :  { %v593_v9 = vadd.f32 %v1186_v7, %v592_v8 }
 0x44d   :  { %959 = vtanh.f32 %v593_v9 }
 0x452   :  { %v595_v10 = vpop.f32.mrf.mxu3 }
 0x453   :  { %v960_v11 = vpop.eup %959  ;;  %v596_v12 = vadd.f32 %v1186_v7, %v595_v10 }
 0x454   :  { %663 = vmatmul.f32.vlgmr.msrb.gmra.mxu0 %v960_v11 }
 0x455   :  { %961 = vtanh.f32 %v596_v12 }
 0x45a   :  { %v598_v13 = vpop.f32.mrf.mxu3 }
 0x45b   :  { %v962_v14 = vpop.eup %961  ;;  %v599_v15 = vadd.f32 %v1186_v7, %v598_v13 }
 0x45c   :  { %666 = vmatmul.f32.gmra.mxu0 %v962_v14 }
 0x45d   :  { %963 = vtanh.f32 %v599_v15  ;;  %v850_v15 = vld [vmem:[%s1292_s5] ss:$0 sm:$0xff] }
 0x462   :  { %v601_v16 = vpop.f32.mrf.mxu3 }
 0x463   :  { %v964_v17 = vpop.eup %963  ;;  %v602_v18 = vadd.f32 %v1186_v7, %v601_v16 }
 0x464   :  { %669 = vmatmul.f32.gmra.mxu0 %v964_v17 }
 0x465   :  { %965 = vtanh.f32 %v602_v18 }
 0x46a   :  { %v604_v19 = vpop.f32.mrf.mxu3 }
 0x46b   :  { %v966_v20 = vpop.eup %965  ;;  %v605_v21 = vadd.f32 %v1186_v7, %v604_v19 }
 0x46c   :  { %672 = vmatmul.f32.gmra.mxu0 %v966_v20 }
 0x46d   :  { %967 = vtanh.f32 %v605_v21 }
 0x472   :  { %v607_v22 = vpop.f32.mrf.mxu3 }
 0x473   :  { %v968_v23 = vpop.eup %967  ;;  %v608_v24 = vadd.f32 %v1186_v7, %v607_v22 }
 0x474   :  { %675 = vmatmul.f32.gmra.mxu0 %v968_v23 }
 0x475   :  { %969 = vtanh.f32 %v608_v24 }
 0x47a   :  { %v610_v29 = vpop.f32.mrf.mxu3 }
 0x47b   :  { %v970_v31 = vpop.eup %969  ;;  %v611_v32 = vadd.f32 %v1186_v7, %v610_v29 }
 0x47c   :  { %678 = vmatmul.f32.gmra.mxu0 %v970_v31 }
 0x47d   :  { %971 = vtanh.f32 %v611_v32 }
 0x482   :  { %v613_v36 = vpop.f32.mrf.mxu3 }
 0x483   :  { %v972_v38 = vpop.eup %971  ;;  %v614_v39 = vadd.f32 %v1186_v7, %v613_v36 }
 0x484   :  { %681 = vmatmul.f32.gmra.mxu0 %v972_v38 }
 0x485   :  { %973 = vtanh.f32 %v614_v39 }
 0x48a   :  { %v616_v43 = vpop.f32.mrf.mxu3 }
 0x48b   :  { %v974_v45 = vpop.eup %973  ;;  %v617_v46 = vadd.f32 %v1186_v7, %v616_v43 }
 0x48c   :  { %684 = vmatmul.f32.gmra.mxu0 %v974_v45 }
 0x48d   :  { %975 = vtanh.f32 %v617_v46 }
 0x493   :  { %v976_v47 = vpop.eup %975 }
 0x494   :  { %687 = vmatmul.f32.vlgmr.msrb.gmra.mxu3 %v976_v47 }
 0x4d1   :  { %v664_v52 = vpop.f32.mrf.mxu0 }
 0x4d2   :  { %v665_v53 = vadd.f32 %v849_v51, %v664_v52 }
 0x4d4   :  { %977 = vtanh.f32 %v665_v53 }
 0x4d9   :  { %v667_v54 = vpop.f32.mrf.mxu0 }
 0x4da   :  { %v978_v55 = vpop.eup %977  ;;  %v668_v56 = vadd.f32 %v849_v51, %v667_v54 }
 0x4db   :  { %736 = vmatmul.f32.vlgmr.msra.gmra.mxu1 %v978_v55 }
 0x4dc   :  { %979 = vtanh.f32 %v668_v56 }
 0x4e1   :  { %v670_v57 = vpop.f32.mrf.mxu0 }
 0x4e2   :  { %v980_v58 = vpop.eup %979  ;;  %v671_v59 = vadd.f32 %v849_v51, %v670_v57 }
 0x4e3   :  { %739 = vmatmul.f32.gmra.mxu1 %v980_v58 }
 0x4e4   :  { %981 = vtanh.f32 %v671_v59 }
 0x4e9   :  { %v673_v60 = vpop.f32.mrf.mxu0 }
 0x4ea   :  { %v982_v61 = vpop.eup %981  ;;  %v674_v62 = vadd.f32 %v849_v51, %v673_v60 }
 0x4eb   :  { %742 = vmatmul.f32.gmra.mxu1 %v982_v61 }
 0x4ec   :  { %983 = vtanh.f32 %v674_v62 }
 0x4f1   :  { %v676_v63 = vpop.f32.mrf.mxu0 }
 0x4f2   :  { %v984_v0 = vpop.eup %983  ;;  %v677_v1 = vadd.f32 %v849_v51, %v676_v63 }
 0x4f3   :  { %745 = vmatmul.f32.gmra.mxu1 %v984_v0 }
 0x4f4   :  { %985 = vtanh.f32 %v677_v1 }
 0x4f9   :  { %v679_v2 = vpop.f32.mrf.mxu0 }
 0x4fa   :  { %v986_v3 = vpop.eup %985  ;;  %v680_v4 = vadd.f32 %v849_v51, %v679_v2 }
 0x4fb   :  { %748 = vmatmul.f32.gmra.mxu1 %v986_v3 }
 0x4fc   :  { %987 = vtanh.f32 %v680_v4 }
 0x501   :  { %v682_v5 = vpop.f32.mrf.mxu0 }
 0x502   :  { %v988_v6 = vpop.eup %987  ;;  %v683_v7 = vadd.f32 %v849_v51, %v682_v5 }
 0x503   :  { %751 = vmatmul.f32.gmra.mxu1 %v988_v6 }
 0x504   :  { %989 = vtanh.f32 %v683_v7 }
 0x509   :  { %v685_v8 = vpop.f32.mrf.mxu0 }
 0x50a   :  { %v990_v9 = vpop.eup %989  ;;  %v686_v10 = vadd.f32 %v849_v51, %v685_v8 }
 0x50b   :  { %754 = vmatmul.f32.gmra.mxu1 %v990_v9 }
 0x50c   :  { %991 = vtanh.f32 %v686_v10 }
 0x512   :  { %v992_v11 = vpop.eup %991 }
 0x513   :  { %757 = vmatmul.f32.gmra.mxu1 %v992_v11 }
 0x517   :  { %v688_v12 = vpop.f32.mrf.mxu3 }
 0x518   :  { %v689_v13 = vadd.f32 %v849_v51, %v688_v12 }
 0x51a   :  { %993 = vtanh.f32 %v689_v13 }
 0x520   :  { %v994_v14 = vpop.eup %993 }
 0x521   :  { %760 = vmatmul.f32.gmra.mxu1 %v994_v14 }
 0x558   :  { %v737_v16 = vpop.f32.mrf.mxu1 }
 0x559   :  { %v738_v17 = vadd.f32 %v850_v15, %v737_v16 }
 0x55b   :  { %764 = vst.msk [vmem:[%s1293_s6] sm:$0xff] %vm53_vm0, %v738_v17 }
 0x560   :  { %v740_v18 = vpop.f32.mrf.mxu1 }
 0x561   :  { %v741_v19 = vadd.f32 %v850_v15, %v740_v18 }
 0x563   :  { %765 = vst.msk [vmem:[%s1293_s6 + $0x8] sm:$0xff] %vm53_vm0, %v741_v19 }
 0x568   :  { %v743_v20 = vpop.f32.mrf.mxu1 }
 0x569   :  { %v744_v21 = vadd.f32 %v850_v15, %v743_v20 }
 0x56b   :  { %766 = vst.msk [vmem:[%s1293_s6 + $0x10] sm:$0xff] %vm53_vm0, %v744_v21 }
 0x570   :  { %v746_v22 = vpop.f32.mrf.mxu1 }
 0x571   :  { %v747_v23 = vadd.f32 %v850_v15, %v746_v22 }
 0x573   :  { %767 = vst.msk [vmem:[%s1293_s6 + $0x18] sm:$0xff] %vm53_vm0, %v747_v23 }
 0x578   :  { %v749_v24 = vpop.f32.mrf.mxu1 }
 0x579   :  { %v750_v25 = vadd.f32 %v850_v15, %v749_v24 }
 0x57b   :  { %768 = vst.msk [vmem:[%s1293_s6 + $0x20] sm:$0xff] %vm53_vm0, %v750_v25 }
 0x580   :  { %v752_v26 = vpop.f32.mrf.mxu1 }
 0x581   :  { %v753_v27 = vadd.f32 %v850_v15, %v752_v26 }
 0x583   :  { %769 = vst.msk [vmem:[%s1293_s6 + $0x28] sm:$0xff] %vm53_vm0, %v753_v27 }
 0x588   :  { %v755_v28 = vpop.f32.mrf.mxu1 }
 0x589   :  { %v756_v29 = vadd.f32 %v850_v15, %v755_v28 }
 0x58b   :  { %770 = vst.msk [vmem:[%s1293_s6 + $0x30] sm:$0xff] %vm53_vm0, %v756_v29 }
 0x590   :  { %v758_v30 = vpop.f32.mrf.mxu1 }
 0x591   :  { %v759_v31 = vadd.f32 %v850_v15, %v758_v30 }
 0x593   :  { %771 = vst.msk [vmem:[%s1293_s6 + $0x38] sm:$0xff] %vm53_vm0, %v759_v31 }
 0x59e   :  { %v761_v32 = vpop.f32.mrf.mxu1 }
 0x59f   :  { %v762_v33 = vadd.f32 %v850_v15, %v761_v32 }
 0x5a1   :  { %772 = vst.msk [vmem:[%s1293_s6 + $0x40] sm:$0xff] %vm53_vm0, %v762_v33 }
 0x5a2   :  { %777 = vsyncpa [#allocation3], 1 }

</bundles_post_ra>
